<compile_context>
chip_gen: v7x
topology: tpu7x:2x2x1
jax: 0.10.0
libtpu: 0.0.40
codegen_flags: <defaults>
</compile_context>

<pallas_src>
import math

import jax
import jax.numpy as jnp
from jax.experimental import pallas as pl
from jax.experimental.pallas import tpu as pltpu

_SQRT_2_OVER_PI = math.sqrt(2.0 / math.pi)


def _gelu_kernel(x_ref, o_ref):
    x = x_ref[...]
    # Compute in f32 for accuracy, cast back to the output dtype.
    xf = x.astype(jnp.float32)
    # sqrt(2/pi) * (x + 0.044715 x^3) == sqrt(2/pi) * x * (1 + 0.044715 x^2)
    x_sq = xf * xf
    inner = jnp.float32(_SQRT_2_OVER_PI) * xf * (
        jnp.float32(1.0) + jnp.float32(0.044715) * x_sq
    )
    y = jnp.float32(0.5) * xf * (jnp.float32(1.0) + jnp.tanh(inner))
    o_ref[...] = y.astype(o_ref.dtype)


def _round_up(a, b):
    return ((a + b - 1) // b) * b


def _vmem_budget():
    """Per-generation (tile_bytes, vmem_limit_bytes) for an HBM-bound kernel."""
    try:
        kind = jax.devices()[0].device_kind.lower()
    except Exception:
        kind = ""
    if any(t in kind for t in ("v2", "v3", "v4", "v5 lite", "v5lite", "v5e")):
        # v5e and older: 0.8 TB/s HBM, 16 MiB scoped-VMEM default -- keep the
        # resident footprint (4x tile) small; larger tiles buy little here.
        return 3 * 1024 * 1024, 24 * 1024 * 1024
    # v6e / v7x (and unknown): 8 MiB tiles.  4x tile (in + out, double
    # buffered) = 32 MiB, under a 40 MiB scoped limit and under v7x's 64 MiB
    # physical VMEM per TensorCore.
    return 8 * 1024 * 1024, 40 * 1024 * 1024


def _gelu_2d(x2):
    """Run the GELU kernel over a 2-D view [R, W] (no padding, no copies)."""
    R, W = x2.shape
    itemsize = jnp.dtype(x2.dtype).itemsize
    target_tile_bytes, vmem_limit_bytes = _vmem_budget()

    # Native sublane tile: 8 (f32), 16 (bf16), 32 (int8).
    sub = max(8, 32 // itemsize)
    row_bytes = max(W * itemsize, 1)

    if R == 1 and row_bytes > 512 * 1024:
        # Rare path: a single long row (e.g. big 1-D tensor with a non-128
        # element count).  Tile along the lane axis; Pallas masks the ragged
        # final block.  Size conservatively for possible sublane padding (8x).
        tw = max(128, ((target_tile_bytes // (8 * itemsize)) // 128) * 128)
        block = (1, tw)
        grid = (pl.cdiv(W, tw),)
        index_map = lambda i: (0, i)
    else:
        # Common path: full-width row tiles (contiguous HBM DMA per block when
        # the width is lane-dense).
        tr = max(sub, ((target_tile_bytes // row_bytes) // sub) * sub)
        if tr >= R:
            # Whole array fits in one target tile.  Split into up to 8
            # sublane-aligned tiles so the pipeline has steps to prefetch
            # against and v7x's two TensorCores each get >=2 steps.
            n_steps = max(1, min(8, R // sub))
            if n_steps == 1:
                tr = R  # single full-extent block
            else:
                tr = _round_up(pl.cdiv(R, n_steps), sub)
        block = (tr, W)
        grid = (pl.cdiv(R, tr),)  # ragged edge block masked by Pallas
        index_map = lambda i: (i, 0)

    n_elems = R * W
    cost = pl.CostEstimate(
        flops=8 * n_elems,
        transcendentals=n_elems,
        bytes_accessed=2 * n_elems * itemsize,
    )

    return pl.pallas_call(
        _gelu_kernel,
        out_shape=jax.ShapeDtypeStruct((R, W), x2.dtype),
        grid_spec=pltpu.PrefetchScalarGridSpec(
            num_scalar_prefetch=0,
            grid=grid,
            in_specs=[pl.BlockSpec(block, index_map)],
            out_specs=pl.BlockSpec(block, index_map),
        ),
        compiler_params=pltpu.CompilerParams(
            dimension_semantics=("parallel",),
            vmem_limit_bytes=vmem_limit_bytes,
        ),
        cost_estimate=cost,
    )(x2)


def gelu_pallas(x):
    """Tanh-approx GELU, elementwise, via a tiled Pallas kernel."""
    orig_shape = x.shape
    n = x.size
    if n == 0:
        return x

    itemsize = jnp.dtype(x.dtype).itemsize

    if n % 128 == 0:
        # Fast path: exact reshape to a wide lane-dense slab (zero padding).
        # Prefer a width that leaves >= 8 rows so sublanes are fully used.
        W = None
        for w in (2048, 1024, 512, 256, 128):
            if n % w == 0 and n // w >= 8:
                W = w
                break
        if W is None:
            for w in (2048, 1024, 512, 256, 128):
                if n % w == 0:
                    W = w
                    break
        out = _gelu_2d(x.reshape(-1, W))
        return out.reshape(orig_shape)

    # Non-128-aligned element count: no pad/slice round trips (those would
    # roughly triple HBM traffic).  Prefer a full-width 2-D view built from
    # trailing dims so rows can be tiled; otherwise run on a (1, n) view.
    if x.ndim >= 2:
        w = 1
        for d in reversed(orig_shape):
            if w >= 128:
                break
            w *= d
        if 128 <= w < n and w * itemsize <= 256 * 1024:
            out = _gelu_2d(x.reshape(-1, w))
            return out.reshape(orig_shape)

    out = _gelu_2d(x.reshape(1, n))
    return out.reshape(orig_shape)


def _gelu_ref(x):
    xf = x.astype(jnp.float32)
    y = 0.5 * xf * (1.0 + jnp.tanh(_SQRT_2_OVER_PI * (xf + 0.044715 * xf ** 3)))
    return y.astype(x.dtype)


if __name__ == "__main__":
    key = jax.random.PRNGKey(0)

    # Primary small NCHW-like input consistent with typical usage.
    x = jax.random.normal(key, (2, 4, 16, 16), dtype=jnp.float32)
    y = gelu_pallas(x)
    jax.block_until_ready(y)
    assert y.shape == x.shape and y.dtype == x.dtype
    assert jnp.allclose(y, _gelu_ref(x), atol=1e-5, rtol=1e-5)

    # Aligned shape exercising a multi-step grid.
    k1, k2 = jax.random.split(key)
    x2 = jax.random.normal(k1, (8, 32, 128), dtype=jnp.float32)
    y2 = gelu_pallas(x2)
    jax.block_until_ready(y2)
    assert jnp.allclose(y2, _gelu_ref(x2), atol=1e-5, rtol=1e-5)

    # Small non-128-aligned shape exercising the single-block fallback.
    x3 = jax.random.normal(k2, (3, 5, 7), dtype=jnp.float32)
    y3 = gelu_pallas(x3)
    jax.block_until_ready(y3)
    assert jnp.allclose(y3, _gelu_ref(x3), atol=1e-5, rtol=1e-5)

    print("KERNEL_OK")
</pallas_src>

<mosaic_0001>
module attributes {stable_mosaic.version = 11 : i64} {
  func.func @_gelu_kernel(%arg0: i32, %arg1: memref<8x256xf32, #tpu.memory_space<vmem>>, %arg2: memref<8x256xf32, #tpu.memory_space<vmem>>) attributes {dimension_semantics = [#tpu.dimension_semantics<parallel>], iteration_bounds = array<i64: 1>, scalar_prefetch = 0 : i64, scratch_operands = 0 : i64, tpu.core_type = #tpu.core_type<tc>, window_params = [{transform_indices = @transform_0, window_bounds = array<i64: 8, 256>}, {transform_indices = @transform_1, window_bounds = array<i64: 8, 256>}]} {
    %c0 = arith.constant 0 : index
    %c0_0 = arith.constant 0 : index
    %0 = vector.load %arg1[%c0, %c0_0] : memref<8x256xf32, #tpu.memory_space<vmem>>, vector<8x256xf32>
    %1 = arith.mulf %0, %0 : vector<8x256xf32>
    %cst = arith.constant 0.797884583 : f32
    %2 = vector.broadcast %cst : f32 to vector<8x256xf32>
    %3 = arith.mulf %2, %0 : vector<8x256xf32>
    %cst_1 = arith.constant 4.471500e-02 : f32
    %4 = vector.broadcast %cst_1 : f32 to vector<8x256xf32>
    %5 = arith.mulf %4, %1 : vector<8x256xf32>
    %cst_2 = arith.constant 1.000000e+00 : f32
    %6 = vector.broadcast %cst_2 : f32 to vector<8x256xf32>
    %7 = arith.addf %6, %5 : vector<8x256xf32>
    %8 = arith.mulf %3, %7 : vector<8x256xf32>
    %cst_3 = arith.constant 5.000000e-01 : f32
    %9 = vector.broadcast %cst_3 : f32 to vector<8x256xf32>
    %10 = arith.mulf %9, %0 : vector<8x256xf32>
    %11 = math.tanh %8 : vector<8x256xf32>
    %cst_4 = arith.constant 1.000000e+00 : f32
    %12 = vector.broadcast %cst_4 : f32 to vector<8x256xf32>
    %13 = arith.addf %12, %11 : vector<8x256xf32>
    %14 = arith.mulf %10, %13 : vector<8x256xf32>
    %c0_5 = arith.constant 0 : index
    %c0_6 = arith.constant 0 : index
    %15 = vector.load %arg2[%c0_5, %c0_6] : memref<8x256xf32, #tpu.memory_space<vmem>>, vector<8x256xf32>
    tpu.vector_store %arg2[%c0_5, %c0_6], %14 {strides = array<i32>} : memref<8x256xf32, #tpu.memory_space<vmem>>, vector<8x256xf32>,
    return
  }
  func.func @transform_0(%arg0: i32) -> (i32, i32) {
    %c0_i32 = arith.constant 0 : i32
    %c0_i32_0 = arith.constant 0 : i32
    return %arg0, %c0_i32 : i32, i32
  }
  func.func @transform_1(%arg0: i32) -> (i32, i32) {
    %c0_i32 = arith.constant 0 : i32
    %c0_i32_0 = arith.constant 0 : i32
    return %arg0, %c0_i32 : i32, i32
  }
}

</mosaic_0001>

<bundles_post_ra>
// kernel: tpu_custom_call.1
= control target key start
LH: loop header
LB: loop body
LE: loop exit
PB: predicated region body
PF: predicated region fallthrough
CT: control target
= control target key end

     0   :  { %6 = vsyncpa [#allocation3], 0  ;;  %s148_s0 = inlined_call_operand.hbm [shape: f32[8,256], index: 0, kind: input, shape index: {}]   ;;  %s149_s1 = inlined_call_operand.hbm [shape: f32[8,256], index: 1, kind: output, shape index: {}]  }
   0x1   :  { %7 = vsyncpa [#allocation4], 0  ;;  %s112_s6 = smov [#allocation2]   ;;  %s64_s10 = scalar_lea.hbm %s148_s0, 256 }
   0x2   :  { %s14_s7 = sshll.u32 %s112_s6, 4  ;;  %p65_p0 = scmp.ne.s32.totalorder %s148_s0, %s64_s10  ;;  %s15_s7 = int_to_ptr.vmem [resolvable:$true] %s14_s7 }
   0x3   :  { %p68_p1 = scmp.lt.u32.totalorder %s64_s10, %s148_s0 }
   0x5   :  { %p70_p2 = pnand %p68_p1, %p65_p0 }
   0x7   :  { %73 = shalt.err (!%p70_p2)
}
   0x8   :  { %s74_s15 = scalar_lea.vmem %s15_s7, 256  ;;  %p79_p4 = scmp.lt.s32.totalorder %s15_s7, %s15_s7 }
   0x9   :  { %p75_p3 = scmp.ne.s32.totalorder %s15_s7, %s74_s15  ;;  %p80_p5 = scmp.lt.s32.totalorder %s74_s15, %s74_s15 }
   0xb   :  { %p81_p6 = por %p80_p5, %p79_p4 }
   0xd   :  { %p82_p7 = pnand %p81_p6, %p75_p3 }
   0xf   :  { %85 = shalt.err (!%p82_p7)
}
  0x10   :  { %17 = dma.hbm_to_vmem [thread:$0]  %s148_s0, 256, %s15_s7, [#allocation3]  }
  0x11   :  { %108 = dma.done.wait [#allocation3], 256  }
  0x12   :  { %109 = vsyncadd [#allocation3], 4294967040  ;;  %v21_v0 = vld [vmem:[#allocation2] sm:$0xff]  ;;  %v22_v1 = vld [vmem:[#allocation2 + $0x8] sm:$0xff]  ;;  %s113_s0 = smov [#allocation5]  }
  0x13   :  { %v23_v2 = vmul.f32 %v21_v0, %v21_v0  ;;  %v24_v3 = vmul.f32 %v22_v1, %v22_v1  ;;  %v25_v4 = vmul.f32 0.7978846, %v21_v0  ;;  %v26_v6 = vmul.f32 0.7978846, %v22_v1  ;;  %s49_s18 = sshll.u32 %s113_s0, 4  ;;  %s50_s18 = int_to_ptr.vmem [resolvable:$true] %s49_s18 }
  0x14   :  { %v33_v12 = vmul.f32 0.5, %v21_v0  ;;  %v34_v14 = vmul.f32 0.5, %v22_v1  ;;  %s86_s19 = scalar_lea.vmem %s50_s18, 256  ;;  %p91_p9 = scmp.lt.s32.totalorder %s50_s18, %s50_s18 }
  0x15   :  { %v27_v5 = vmul.f32 0.044715, %v23_v2  ;;  %v28_v7 = vmul.f32 0.044715, %v24_v3  ;;  %p87_p8 = scmp.ne.s32.totalorder %s50_s18, %s86_s19  ;;  %p92_p10 = scmp.lt.s32.totalorder %s86_s19, %s86_s19 }
  0x17   :  { %v29_v8 = vadd.f32 1.0, %v27_v5  ;;  %v30_v9 = vadd.f32 1.0, %v28_v7  ;;  %p93_p11 = por %p92_p10, %p91_p9 }
  0x19   :  { %v31_v10 = vmul.f32 %v29_v8, %v25_v4  ;;  %v32_v11 = vmul.f32 %v30_v9, %v26_v6  ;;  %p94_p12 = pnand %p93_p11, %p87_p8 }
  0x1b   :  { %60 = vtanh.f32 %v31_v10 }
  0x1c   :  { %62 = vtanh.f32 %v32_v11 }
  0x25   :  { %v61_v13 = vpop.eup %60 }
  0x26   :  { %v63_v15 = vpop.eup %62  ;;  %v37_v16 = vadd.f32 1.0, %v61_v13 }
  0x27   :  { %v38_v17 = vadd.f32 1.0, %v63_v15 }
  0x28   :  { %v39_v18 = vmul.f32 %v37_v16, %v33_v12 }
  0x29   :  { %v40_v19 = vmul.f32 %v38_v17, %v34_v14 }
  0x2a   :  { %41 = vst [vmem:[#allocation5] sm:$0xff] %v39_v18 }
  0x2b   :  { %42 = vst [vmem:[#allocation5 + $0x8] sm:$0xff] %v40_v19 }
  0x2c   :  { %97 = shalt.err (!%p94_p12)
}
  0x2d   :  { %s98_s22 = scalar_lea.hbm %s149_s1, 256 }
  0x2e   :  { %p99_p13 = scmp.ne.s32.totalorder %s149_s1, %s98_s22  ;;  %p102_p0 = scmp.lt.u32.totalorder %s98_s22, %s149_s1 }
  0x30   :  { %p104_p1 = pnand %p102_p0, %p99_p13 }
  0x32   :  { %107 = shalt.err (!%p104_p1)
}
  0x33   :  { %52 = dma.vmem_to_hbm [thread:$0]  %s50_s18, 256, %s149_s1, [#allocation4]  }
  0x34   :  { %110 = dma.done.wait [#allocation4], 256  }
  0x35   :  { %111 = vsyncadd [#allocation4], 4294967040 }
  0x36   :  { %56 = vsyncpa [#allocation3], 1 }
  0x37   :  { %57 = vsyncpa [#allocation4], 1 }

</bundles_post_ra>
